<compile_context>
chip_gen: v5e
topology: v5e:2x2
jax: 0.10.0
libtpu: 0.0.40
codegen_flags: <defaults>
</compile_context>

<pallas_src>
import functools

import jax
import jax.numpy as jnp
from jax.experimental import pallas as pl
from jax.experimental.pallas import tpu as pltpu


def _round_up(x, m):
    return ((x + m - 1) // m) * m


def convnormact_kernel(x_ref, w_ref, b_ref, o_ref, *, tap_offsets):
    """Fused conv + bias + ReLU on a block of Nb images.

    x_ref : (Nb, Cin, P)        flattened, zero-padded input images (VMEM)
    w_ref : (T, Cout, Cin)      per-tap weight matrices
    b_ref : (Cout, 1)           f32 bias column (broadcasts along lanes)
    o_ref : (Nb, Cout, Me_pad)  extended, NCHW-flat, lane-dense output
    """
    nb, cout, me = o_ref.shape
    w_all = w_ref[...]                      # (T, Cout, Cin) -- tiny, resident
    bias = b_ref[...]                       # (Cout, 1) f32

    def one_image(i, carry):
        x_img = x_ref[i]                    # (Cin, P) -- loaded once into vregs
        # Bias-initialized f32 accumulator (saves a separate full-width add).
        acc = jnp.broadcast_to(bias, (cout, me)).astype(jnp.float32)
        # Static unroll over the KH*KW taps: each tap is a lane-shifted slice
        # of the resident image plus one small K=Cin MXU pass.  HBM bandwidth,
        # not the MXU, is the binding unit for this op.
        for t, off in enumerate(tap_offsets):
            x_tap = x_img[:, off:off + me]  # (Cin, Me_pad)
            acc = acc + jnp.dot(w_all[t], x_tap,
                                preferred_element_type=jnp.float32)
        acc = jnp.maximum(acc, 0.0)         # Activation('relu')
        # TODO(synk): self._norm is None in this configuration -> no norm op.
        o_ref[i] = acc.astype(o_ref.dtype)
        return carry

    jax.lax.fori_loop(0, nb, one_image, None, unroll=True)


def conv_norm_act_extended(x_nchw, weight_oihw, bias, *,
                           stream_dtype=jnp.bfloat16, out_dtype=None,
                           vmem_budget_bytes=16 * 1024 * 1024):
    """Conv2d(stride=1, padding='same') + bias + ReLU, NCHW input.

    Returns (out_ext, (H, W, Wp)) where out_ext has shape (N, Cout, Me_pad):
    valid output pixel (r, c) lives at lane r * Wp + c.  Use extended_to_nchw
    (or fuse the slice into the consumer) to recover NCHW.
    """
    N, Cin, H, W = x_nchw.shape
    Cout, Cin_w, KH, KW = weight_oihw.shape
    assert Cin_w == Cin
    # Scope: 'same' padding, stride=1, dilation=1, groups=1, odd kernels only
    # (PyTorch pads asymmetrically for even kernels -- not handled here).
    assert KH % 2 == 1 and KW % 2 == 1
    if out_dtype is None:
        out_dtype = x_nchw.dtype

    ph, pw = (KH - 1) // 2, (KW - 1) // 2
    Wp = W + 2 * pw                          # padded row width
    Me = H * Wp                              # extended output positions / image
    Me_pad = _round_up(Me, 128)              # lane-dense output width
    max_off = (KH - 1) * Wp + (KW - 1)       # largest tap offset
    # Single fused pad: grow H so the flattened image already covers the
    # largest in-kernel read (Me_pad + max_off).  bottom pad stays >= ph, so
    # the 'same' zero rows below the image are preserved.
    Hx = -(-(Me_pad + max_off) // Wp)        # ceil div
    pad_bottom = Hx - H - ph
    assert pad_bottom >= ph
    P_img = Hx * Wp
    assert P_img >= Me_pad + max_off         # in-kernel tap reads stay in-bounds

    xf = jnp.pad(x_nchw.astype(stream_dtype),
                 ((0, 0), (0, 0), (ph, pad_bottom), (pw, pw)))
    xf = xf.reshape(N, Cin, P_img)           # free trailing-dim reshape

    # Per-tap weights (T, Cout, Cin); bias as a sublane-dense f32 column.
    w_taps = jnp.transpose(weight_oihw, (2, 3, 0, 1)).reshape(KH * KW, Cout, Cin)
    w_taps = w_taps.astype(stream_dtype)
    b_col = bias.reshape(Cout, 1).astype(jnp.float32)

    # Images per grid step: as many as fit a conservative double-buffered VMEM
    # budget; when the batch allows, keep >= 4 grid steps so both v7x
    # TensorCores get >= 2 pipelined steps each.
    per_img_bytes = (Cin * P_img * jnp.dtype(stream_dtype).itemsize
                     + Cout * Me_pad * jnp.dtype(out_dtype).itemsize)
    nb = max(1, int(vmem_budget_bytes // (2 * per_img_bytes)))
    nb = min(nb, N)
    if N >= 4:
        nb = min(nb, max(1, N // 4))
    while N % nb:                            # keep the grid exact
        nb -= 1
    # TODO(synk): very large single images (per_img_bytes > budget) would need
    # an extra row-block grid axis with a ph-row halo; not needed at these
    # shapes.

    tap_offsets = tuple(kh * Wp + kw for kh in range(KH) for kw in range(KW))
    kernel = functools.partial(convnormact_kernel, tap_offsets=tap_offsets)

    out_ext = pl.pallas_call(
        kernel,
        out_shape=jax.ShapeDtypeStruct((N, Cout, Me_pad), out_dtype),
        grid=(N // nb,),
        in_specs=[
            pl.BlockSpec((nb, Cin, P_img), lambda g: (g, 0, 0)),
            pl.BlockSpec((KH * KW, Cout, Cin), lambda g: (0, 0, 0)),
            pl.BlockSpec((Cout, 1), lambda g: (0, 0)),
        ],
        out_specs=pl.BlockSpec((nb, Cout, Me_pad), lambda g: (g, 0, 0)),
        compiler_params=pltpu.CompilerParams(
            dimension_semantics=("parallel",),
            vmem_limit_bytes=32 * 1024 * 1024),
    )(xf, w_taps, b_col)

    return out_ext, (H, W, Wp)


def extended_to_nchw(out_ext, H, W, Wp):
    """Drop lane padding and the 2*pw wrap-around columns -> NCHW.
    Consumers that can read the extended lane-dense layout should skip this
    (it re-reads/re-writes the whole output)."""
    N, Cout, _ = out_ext.shape
    return out_ext[:, :, :H * Wp].reshape(N, Cout, H, Wp)[:, :, :, :W]


def conv_norm_act(x_nchw, weight_oihw, bias, **kwargs):
    out_ext, (H, W, Wp) = conv_norm_act_extended(x_nchw, weight_oihw, bias, **kwargs)
    return extended_to_nchw(out_ext, H, W, Wp)


if __name__ == "__main__":
    key = jax.random.PRNGKey(0)
    kx, kw, kb = jax.random.split(key, 3)

    # Shapes implied by the module: NCHW input, Conv2d(4 -> 8, 3x3).
    N, Cin, H, W = 2, 4, 16, 16
    Cout, K = 8, 3

    x = jax.random.normal(kx, (N, Cin, H, W), jnp.float32)
    weight = jax.random.normal(kw, (Cout, Cin, K, K), jnp.float32) * 0.1
    bias = jax.random.normal(kb, (Cout,), jnp.float32) * 0.1

    def ref_conv(xr, wr):
        y = jax.lax.conv_general_dilated(
            xr, wr, window_strides=(1, 1), padding="SAME",
            dimension_numbers=("NCHW", "OIHW", "NCHW"))
        return jnp.maximum(y + bias[None, :, None, None], 0.0)

    # Default path: bf16-streamed, f32 accumulation.  The kernel result is the
    # extended lane-dense layout (what a fused consumer would take); the NCHW
    # de-pad is applied afterwards only for the correctness check.
    out_ext, (H_, W_, Wp_) = conv_norm_act_extended(x, weight, bias)
    out_ext = jax.block_until_ready(out_ext)
    out = extended_to_nchw(out_ext, H_, W_, Wp_)
    assert out.shape == (N, Cout, H, W)

    x_q = x.astype(jnp.bfloat16).astype(jnp.float32)
    w_q = weight.astype(jnp.bfloat16).astype(jnp.float32)
    assert jnp.allclose(out, ref_conv(x_q, w_q), atol=1e-3, rtol=1e-3)

    # f32-streamed path reproduces the module's f32 forward semantics.
    out_f32 = jax.block_until_ready(
        conv_norm_act(x, weight, bias, stream_dtype=jnp.float32))
    assert jnp.allclose(out_f32, ref_conv(x, weight), atol=1e-4, rtol=1e-4)

    print("KERNEL_OK")
</pallas_src>

<mosaic_0001>
module attributes {stable_mosaic.version = 11 : i64} {
  func.func @convnormact_kernel(%arg0: i32, %arg1: memref<2x4x432xbf16, #tpu.memory_space<vmem>>, %arg2: memref<9x8x4xbf16, #tpu.memory_space<vmem>>, %arg3: memref<8x1xf32, #tpu.memory_space<vmem>>, %arg4: memref<2x8x384xf32, #tpu.memory_space<vmem>>) attributes {dimension_semantics = [#tpu.dimension_semantics<parallel>], iteration_bounds = array<i64: 1>, scalar_prefetch = 0 : i64, scratch_operands = 0 : i64, tpu.core_type = #tpu.core_type<tc>, window_params = [{transform_indices = @transform_0, window_bounds = array<i64: 2, 4, 432>}, {pipeline_mode = #tpu.pipeline_mode<synchronous>, transform_indices = @transform_1, window_bounds = array<i64: 9, 8, 4>}, {pipeline_mode = #tpu.pipeline_mode<synchronous>, transform_indices = @transform_2, window_bounds = array<i64: 8, 1>}, {transform_indices = @transform_3, window_bounds = array<i64: 2, 8, 384>}]} {
    %c0 = arith.constant 0 : index
    %c0_0 = arith.constant 0 : index
    %c0_1 = arith.constant 0 : index
    %0 = vector.load %arg2[%c0, %c0_0, %c0_1] : memref<9x8x4xbf16, #tpu.memory_space<vmem>>, vector<9x8x4xbf16>
    %c0_2 = arith.constant 0 : index
    %c0_3 = arith.constant 0 : index
    %1 = vector.load %arg3[%c0_2, %c0_3] : memref<8x1xf32, #tpu.memory_space<vmem>>, vector<8x1xf32>
    %c0_i32 = arith.constant 0 : i32
    %2 = arith.index_cast %c0_i32 : i32 to index
    %c0_4 = arith.constant 0 : index
    %c0_5 = arith.constant 0 : index
    %3 = vector.load %arg1[%2, %c0_4, %c0_5] : memref<2x4x432xbf16, #tpu.memory_space<vmem>>, vector<1x4x432xbf16>
    %4 = vector.shape_cast %3 : vector<1x4x432xbf16> to vector<4x432xbf16>
    %5 = vector.shape_cast %1 : vector<8x1xf32> to vector<8x1xf32>
    %6 = vector.broadcast %5 : vector<8x1xf32> to vector<8x384xf32>
    %7 = vector.extract_strided_slice %4 {offsets = [0, 0], sizes = [4, 384], strides = [1, 1]} : vector<4x432xbf16> to vector<4x384xbf16>
    %8 = vector.extract_strided_slice %0 {offsets = [0, 0, 0], sizes = [1, 8, 4], strides = [1, 1, 1]} : vector<9x8x4xbf16> to vector<1x8x4xbf16>
    %9 = vector.shape_cast %8 : vector<1x8x4xbf16> to vector<8x4xbf16>
    %cst = arith.constant dense<0.000000e+00> : vector<8x384xf32>
    %10 = tpu.matmul %9, %7, %cst {dimension_numbers = #tpu.dot_dimension_numbers<[1], [0], [0], [1], [0, 0, 1, 1], [], []>} : vector<8x4xbf16>, vector<4x384xbf16>, vector<8x384xf32> -> vector<8x384xf32>
    %11 = arith.addf %6, %10 : vector<8x384xf32>
    %12 = vector.extract_strided_slice %4 {offsets = [0, 1], sizes = [4, 384], strides = [1, 1]} : vector<4x432xbf16> to vector<4x384xbf16>
    %13 = vector.extract_strided_slice %0 {offsets = [1, 0, 0], sizes = [1, 8, 4], strides = [1, 1, 1]} : vector<9x8x4xbf16> to vector<1x8x4xbf16>
    %14 = vector.shape_cast %13 : vector<1x8x4xbf16> to vector<8x4xbf16>
    %cst_6 = arith.constant dense<0.000000e+00> : vector<8x384xf32>
    %15 = tpu.matmul %14, %12, %cst_6 {dimension_numbers = #tpu.dot_dimension_numbers<[1], [0], [0], [1], [0, 0, 1, 1], [], []>} : vector<8x4xbf16>, vector<4x384xbf16>, vector<8x384xf32> -> vector<8x384xf32>
    %16 = arith.addf %11, %15 : vector<8x384xf32>
    %17 = vector.extract_strided_slice %4 {offsets = [0, 2], sizes = [4, 384], strides = [1, 1]} : vector<4x432xbf16> to vector<4x384xbf16>
    %18 = vector.extract_strided_slice %0 {offsets = [2, 0, 0], sizes = [1, 8, 4], strides = [1, 1, 1]} : vector<9x8x4xbf16> to vector<1x8x4xbf16>
    %19 = vector.shape_cast %18 : vector<1x8x4xbf16> to vector<8x4xbf16>
    %cst_7 = arith.constant dense<0.000000e+00> : vector<8x384xf32>
    %20 = tpu.matmul %19, %17, %cst_7 {dimension_numbers = #tpu.dot_dimension_numbers<[1], [0], [0], [1], [0, 0, 1, 1], [], []>} : vector<8x4xbf16>, vector<4x384xbf16>, vector<8x384xf32> -> vector<8x384xf32>
    %21 = arith.addf %16, %20 : vector<8x384xf32>
    %22 = vector.extract_strided_slice %4 {offsets = [0, 18], sizes = [4, 384], strides = [1, 1]} : vector<4x432xbf16> to vector<4x384xbf16>
    %23 = vector.extract_strided_slice %0 {offsets = [3, 0, 0], sizes = [1, 8, 4], strides = [1, 1, 1]} : vector<9x8x4xbf16> to vector<1x8x4xbf16>
    %24 = vector.shape_cast %23 : vector<1x8x4xbf16> to vector<8x4xbf16>
    %cst_8 = arith.constant dense<0.000000e+00> : vector<8x384xf32>
    %25 = tpu.matmul %24, %22, %cst_8 {dimension_numbers = #tpu.dot_dimension_numbers<[1], [0], [0], [1], [0, 0, 1, 1], [], []>} : vector<8x4xbf16>, vector<4x384xbf16>, vector<8x384xf32> -> vector<8x384xf32>
    %26 = arith.addf %21, %25 : vector<8x384xf32>
    %27 = vector.extract_strided_slice %4 {offsets = [0, 19], sizes = [4, 384], strides = [1, 1]} : vector<4x432xbf16> to vector<4x384xbf16>
    %28 = vector.extract_strided_slice %0 {offsets = [4, 0, 0], sizes = [1, 8, 4], strides = [1, 1, 1]} : vector<9x8x4xbf16> to vector<1x8x4xbf16>
    %29 = vector.shape_cast %28 : vector<1x8x4xbf16> to vector<8x4xbf16>
    %cst_9 = arith.constant dense<0.000000e+00> : vector<8x384xf32>
    %30 = tpu.matmul %29, %27, %cst_9 {dimension_numbers = #tpu.dot_dimension_numbers<[1], [0], [0], [1], [0, 0, 1, 1], [], []>} : vector<8x4xbf16>, vector<4x384xbf16>, vector<8x384xf32> -> vector<8x384xf32>
    %31 = arith.addf %26, %30 : vector<8x384xf32>
    %32 = vector.extract_strided_slice %4 {offsets = [0, 20], sizes = [4, 384], strides = [1, 1]} : vector<4x432xbf16> to vector<4x384xbf16>
    %33 = vector.extract_strided_slice %0 {offsets = [5, 0, 0], sizes = [1, 8, 4], strides = [1, 1, 1]} : vector<9x8x4xbf16> to vector<1x8x4xbf16>
    %34 = vector.shape_cast %33 : vector<1x8x4xbf16> to vector<8x4xbf16>
    %cst_10 = arith.constant dense<0.000000e+00> : vector<8x384xf32>
    %35 = tpu.matmul %34, %32, %cst_10 {dimension_numbers = #tpu.dot_dimension_numbers<[1], [0], [0], [1], [0, 0, 1, 1], [], []>} : vector<8x4xbf16>, vector<4x384xbf16>, vector<8x384xf32> -> vector<8x384xf32>
    %36 = arith.addf %31, %35 : vector<8x384xf32>
    %37 = vector.extract_strided_slice %4 {offsets = [0, 36], sizes = [4, 384], strides = [1, 1]} : vector<4x432xbf16> to vector<4x384xbf16>
    %38 = vector.extract_strided_slice %0 {offsets = [6, 0, 0], sizes = [1, 8, 4], strides = [1, 1, 1]} : vector<9x8x4xbf16> to vector<1x8x4xbf16>
    %39 = vector.shape_cast %38 : vector<1x8x4xbf16> to vector<8x4xbf16>
    %cst_11 = arith.constant dense<0.000000e+00> : vector<8x384xf32>
    %40 = tpu.matmul %39, %37, %cst_11 {dimension_numbers = #tpu.dot_dimension_numbers<[1], [0], [0], [1], [0, 0, 1, 1], [], []>} : vector<8x4xbf16>, vector<4x384xbf16>, vector<8x384xf32> -> vector<8x384xf32>
    %41 = arith.addf %36, %40 : vector<8x384xf32>
    %42 = vector.extract_strided_slice %4 {offsets = [0, 37], sizes = [4, 384], strides = [1, 1]} : vector<4x432xbf16> to vector<4x384xbf16>
    %43 = vector.extract_strided_slice %0 {offsets = [7, 0, 0], sizes = [1, 8, 4], strides = [1, 1, 1]} : vector<9x8x4xbf16> to vector<1x8x4xbf16>
    %44 = vector.shape_cast %43 : vector<1x8x4xbf16> to vector<8x4xbf16>
    %cst_12 = arith.constant dense<0.000000e+00> : vector<8x384xf32>
    %45 = tpu.matmul %44, %42, %cst_12 {dimension_numbers = #tpu.dot_dimension_numbers<[1], [0], [0], [1], [0, 0, 1, 1], [], []>} : vector<8x4xbf16>, vector<4x384xbf16>, vector<8x384xf32> -> vector<8x384xf32>
    %46 = arith.addf %41, %45 : vector<8x384xf32>
    %47 = vector.extract_strided_slice %4 {offsets = [0, 38], sizes = [4, 384], strides = [1, 1]} : vector<4x432xbf16> to vector<4x384xbf16>
    %48 = vector.extract_strided_slice %0 {offsets = [8, 0, 0], sizes = [1, 8, 4], strides = [1, 1, 1]} : vector<9x8x4xbf16> to vector<1x8x4xbf16>
    %49 = vector.shape_cast %48 : vector<1x8x4xbf16> to vector<8x4xbf16>
    %cst_13 = arith.constant dense<0.000000e+00> : vector<8x384xf32>
    %50 = tpu.matmul %49, %47, %cst_13 {dimension_numbers = #tpu.dot_dimension_numbers<[1], [0], [0], [1], [0, 0, 1, 1], [], []>} : vector<8x4xbf16>, vector<4x384xbf16>, vector<8x384xf32> -> vector<8x384xf32>
    %51 = arith.addf %46, %50 : vector<8x384xf32>
    %cst_14 = arith.constant 0.000000e+00 : f32
    %52 = vector.broadcast %cst_14 : f32 to vector<8x384xf32>
    %53 = arith.maximumf %51, %52 : vector<8x384xf32>
    %54 = arith.index_cast %c0_i32 : i32 to index
    %c0_15 = arith.constant 0 : index
    %c0_16 = arith.constant 0 : index
    %55 = vector.load %arg4[%54, %c0_15, %c0_16] : memref<2x8x384xf32, #tpu.memory_space<vmem>>, vector<1x8x384xf32>
    %56 = vector.shape_cast %55 : vector<1x8x384xf32> to vector<8x384xf32>
    %57 = vector.shape_cast %53 : vector<8x384xf32> to vector<1x8x384xf32>
    tpu.vector_store %arg4[%54, %c0_15, %c0_16], %57 {strides = array<i32>} : memref<2x8x384xf32, #tpu.memory_space<vmem>>, vector<1x8x384xf32>,
    %c1_i32 = arith.constant 1 : i32
    %58 = arith.index_cast %c1_i32 : i32 to index
    %c0_17 = arith.constant 0 : index
    %c0_18 = arith.constant 0 : index
    %59 = vector.load %arg1[%58, %c0_17, %c0_18] : memref<2x4x432xbf16, #tpu.memory_space<vmem>>, vector<1x4x432xbf16>
    %60 = vector.shape_cast %59 : vector<1x4x432xbf16> to vector<4x432xbf16>
    %61 = vector.shape_cast %1 : vector<8x1xf32> to vector<8x1xf32>
    %62 = vector.broadcast %61 : vector<8x1xf32> to vector<8x384xf32>
    %63 = vector.extract_strided_slice %60 {offsets = [0, 0], sizes = [4, 384], strides = [1, 1]} : vector<4x432xbf16> to vector<4x384xbf16>
    %64 = vector.extract_strided_slice %0 {offsets = [0, 0, 0], sizes = [1, 8, 4], strides = [1, 1, 1]} : vector<9x8x4xbf16> to vector<1x8x4xbf16>
    %65 = vector.shape_cast %64 : vector<1x8x4xbf16> to vector<8x4xbf16>
    %cst_19 = arith.constant dense<0.000000e+00> : vector<8x384xf32>
    %66 = tpu.matmul %65, %63, %cst_19 {dimension_numbers = #tpu.dot_dimension_numbers<[1], [0], [0], [1], [0, 0, 1, 1], [], []>} : vector<8x4xbf16>, vector<4x384xbf16>, vector<8x384xf32> -> vector<8x384xf32>
    %67 = arith.addf %62, %66 : vector<8x384xf32>
    %68 = vector.extract_strided_slice %60 {offsets = [0, 1], sizes = [4, 384], strides = [1, 1]} : vector<4x432xbf16> to vector<4x384xbf16>
    %69 = vector.extract_strided_slice %0 {offsets = [1, 0, 0], sizes = [1, 8, 4], strides = [1, 1, 1]} : vector<9x8x4xbf16> to vector<1x8x4xbf16>
    %70 = vector.shape_cast %69 : vector<1x8x4xbf16> to vector<8x4xbf16>
    %cst_20 = arith.constant dense<0.000000e+00> : vector<8x384xf32>
    %71 = tpu.matmul %70, %68, %cst_20 {dimension_numbers = #tpu.dot_dimension_numbers<[1], [0], [0], [1], [0, 0, 1, 1], [], []>} : vector<8x4xbf16>, vector<4x384xbf16>, vector<8x384xf32> -> vector<8x384xf32>
    %72 = arith.addf %67, %71 : vector<8x384xf32>
    %73 = vector.extract_strided_slice %60 {offsets = [0, 2], sizes = [4, 384], strides = [1, 1]} : vector<4x432xbf16> to vector<4x384xbf16>
    %74 = vector.extract_strided_slice %0 {offsets = [2, 0, 0], sizes = [1, 8, 4], strides = [1, 1, 1]} : vector<9x8x4xbf16> to vector<1x8x4xbf16>
    %75 = vector.shape_cast %74 : vector<1x8x4xbf16> to vector<8x4xbf16>
    %cst_21 = arith.constant dense<0.000000e+00> : vector<8x384xf32>
    %76 = tpu.matmul %75, %73, %cst_21 {dimension_numbers = #tpu.dot_dimension_numbers<[1], [0], [0], [1], [0, 0, 1, 1], [], []>} : vector<8x4xbf16>, vector<4x384xbf16>, vector<8x384xf32> -> vector<8x384xf32>
    %77 = arith.addf %72, %76 : vector<8x384xf32>
    %78 = vector.extract_strided_slice %60 {offsets = [0, 18], sizes = [4, 384], strides = [1, 1]} : vector<4x432xbf16> to vector<4x384xbf16>
    %79 = vector.extract_strided_slice %0 {offsets = [3, 0, 0], sizes = [1, 8, 4], strides = [1, 1, 1]} : vector<9x8x4xbf16> to vector<1x8x4xbf16>
    %80 = vector.shape_cast %79 : vector<1x8x4xbf16> to vector<8x4xbf16>
    %cst_22 = arith.constant dense<0.000000e+00> : vector<8x384xf32>
    %81 = tpu.matmul %80, %78, %cst_22 {dimension_numbers = #tpu.dot_dimension_numbers<[1], [0], [0], [1], [0, 0, 1, 1], [], []>} : vector<8x4xbf16>, vector<4x384xbf16>, vector<8x384xf32> -> vector<8x384xf32>
    %82 = arith.addf %77, %81 : vector<8x384xf32>
    %83 = vector.extract_strided_slice %60 {offsets = [0, 19], sizes = [4, 384], strides = [1, 1]} : vector<4x432xbf16> to vector<4x384xbf16>
    %84 = vector.extract_strided_slice %0 {offsets = [4, 0, 0], sizes = [1, 8, 4], strides = [1, 1, 1]} : vector<9x8x4xbf16> to vector<1x8x4xbf16>
    %85 = vector.shape_cast %84 : vector<1x8x4xbf16> to vector<8x4xbf16>
    %cst_23 = arith.constant dense<0.000000e+00> : vector<8x384xf32>
    %86 = tpu.matmul %85, %83, %cst_23 {dimension_numbers = #tpu.dot_dimension_numbers<[1], [0], [0], [1], [0, 0, 1, 1], [], []>} : vector<8x4xbf16>, vector<4x384xbf16>, vector<8x384xf32> -> vector<8x384xf32>
    %87 = arith.addf %82, %86 : vector<8x384xf32>
    %88 = vector.extract_strided_slice %60 {offsets = [0, 20], sizes = [4, 384], strides = [1, 1]} : vector<4x432xbf16> to vector<4x384xbf16>
    %89 = vector.extract_strided_slice %0 {offsets = [5, 0, 0], sizes = [1, 8, 4], strides = [1, 1, 1]} : vector<9x8x4xbf16> to vector<1x8x4xbf16>
    %90 = vector.shape_cast %89 : vector<1x8x4xbf16> to vector<8x4xbf16>
    %cst_24 = arith.constant dense<0.000000e+00> : vector<8x384xf32>
    %91 = tpu.matmul %90, %88, %cst_24 {dimension_numbers = #tpu.dot_dimension_numbers<[1], [0], [0], [1], [0, 0, 1, 1], [], []>} : vector<8x4xbf16>, vector<4x384xbf16>, vector<8x384xf32> -> vector<8x384xf32>
    %92 = arith.addf %87, %91 : vector<8x384xf32>
    %93 = vector.extract_strided_slice %60 {offsets = [0, 36], sizes = [4, 384], strides = [1, 1]} : vector<4x432xbf16> to vector<4x384xbf16>
    %94 = vector.extract_strided_slice %0 {offsets = [6, 0, 0], sizes = [1, 8, 4], strides = [1, 1, 1]} : vector<9x8x4xbf16> to vector<1x8x4xbf16>
    %95 = vector.shape_cast %94 : vector<1x8x4xbf16> to vector<8x4xbf16>
    %cst_25 = arith.constant dense<0.000000e+00> : vector<8x384xf32>
    %96 = tpu.matmul %95, %93, %cst_25 {dimension_numbers = #tpu.dot_dimension_numbers<[1], [0], [0], [1], [0, 0, 1, 1], [], []>} : vector<8x4xbf16>, vector<4x384xbf16>, vector<8x384xf32> -> vector<8x384xf32>
    %97 = arith.addf %92, %96 : vector<8x384xf32>
    %98 = vector.extract_strided_slice %60 {offsets = [0, 37], sizes = [4, 384], strides = [1, 1]} : vector<4x432xbf16> to vector<4x384xbf16>
    %99 = vector.extract_strided_slice %0 {offsets = [7, 0, 0], sizes = [1, 8, 4], strides = [1, 1, 1]} : vector<9x8x4xbf16> to vector<1x8x4xbf16>
    %100 = vector.shape_cast %99 : vector<1x8x4xbf16> to vector<8x4xbf16>
    %cst_26 = arith.constant dense<0.000000e+00> : vector<8x384xf32>
    %101 = tpu.matmul %100, %98, %cst_26 {dimension_numbers = #tpu.dot_dimension_numbers<[1], [0], [0], [1], [0, 0, 1, 1], [], []>} : vector<8x4xbf16>, vector<4x384xbf16>, vector<8x384xf32> -> vector<8x384xf32>
    %102 = arith.addf %97, %101 : vector<8x384xf32>
    %103 = vector.extract_strided_slice %60 {offsets = [0, 38], sizes = [4, 384], strides = [1, 1]} : vector<4x432xbf16> to vector<4x384xbf16>
    %104 = vector.extract_strided_slice %0 {offsets = [8, 0, 0], sizes = [1, 8, 4], strides = [1, 1, 1]} : vector<9x8x4xbf16> to vector<1x8x4xbf16>
    %105 = vector.shape_cast %104 : vector<1x8x4xbf16> to vector<8x4xbf16>
    %cst_27 = arith.constant dense<0.000000e+00> : vector<8x384xf32>
    %106 = tpu.matmul %105, %103, %cst_27 {dimension_numbers = #tpu.dot_dimension_numbers<[1], [0], [0], [1], [0, 0, 1, 1], [], []>} : vector<8x4xbf16>, vector<4x384xbf16>, vector<8x384xf32> -> vector<8x384xf32>
    %107 = arith.addf %102, %106 : vector<8x384xf32>
    %cst_28 = arith.constant 0.000000e+00 : f32
    %108 = vector.broadcast %cst_28 : f32 to vector<8x384xf32>
    %109 = arith.maximumf %107, %108 : vector<8x384xf32>
    %110 = arith.index_cast %c1_i32 : i32 to index
    %c0_29 = arith.constant 0 : index
    %c0_30 = arith.constant 0 : index
    %111 = vector.load %arg4[%110, %c0_29, %c0_30] : memref<2x8x384xf32, #tpu.memory_space<vmem>>, vector<1x8x384xf32>
    %112 = vector.shape_cast %111 : vector<1x8x384xf32> to vector<8x384xf32>
    %113 = vector.shape_cast %109 : vector<8x384xf32> to vector<1x8x384xf32>
    tpu.vector_store %arg4[%110, %c0_29, %c0_30], %113 {strides = array<i32>} : memref<2x8x384xf32, #tpu.memory_space<vmem>>, vector<1x8x384xf32>,
    %c2_i32 = arith.constant 2 : i32
    return
  }
  func.func @transform_0(%arg0: i32) -> (i32, i32, i32) {
    %c0_i32 = arith.constant 0 : i32
    %c0_i32_0 = arith.constant 0 : i32
    %c0_i32_1 = arith.constant 0 : i32
    return %arg0, %c0_i32, %c0_i32_0 : i32, i32, i32
  }
  func.func @transform_1(%arg0: i32) -> (i32, i32, i32) {
    %c0_i32 = arith.constant 0 : i32
    %c0_i32_0 = arith.constant 0 : i32
    %c0_i32_1 = arith.constant 0 : i32
    %c0_i32_2 = arith.constant 0 : i32
    return %c0_i32, %c0_i32_0, %c0_i32_1 : i32, i32, i32
  }
  func.func @transform_2(%arg0: i32) -> (i32, i32) {
    %c0_i32 = arith.constant 0 : i32
    %c0_i32_0 = arith.constant 0 : i32
    %c0_i32_1 = arith.constant 0 : i32
    return %c0_i32, %c0_i32_0 : i32, i32
  }
  func.func @transform_3(%arg0: i32) -> (i32, i32, i32) {
    %c0_i32 = arith.constant 0 : i32
    %c0_i32_0 = arith.constant 0 : i32
    %c0_i32_1 = arith.constant 0 : i32
    return %arg0, %c0_i32, %c0_i32_0 : i32, i32, i32
  }
}

</mosaic_0001>

<bundles_post_ra>
// kernel: tpu_custom_call.1
= control target key start
LH: loop header
LB: loop body
LE: loop exit
PB: predicated region body
PF: predicated region fallthrough
CT: control target
= control target key end

     0   :  { %s1877_s0 = inlined_call_operand.vmem [shape: bf16[2,4,432], index: 0, kind: input, shape index: {}]   ;;  %s1878_s1 = inlined_call_operand.vmem [shape: bf16[9,8,4], index: 1, kind: input, shape index: {}]   ;;  %s1879_s2 = inlined_call_operand.vmem [shape: f32[8,1], index: 2, kind: input, shape index: {}]   ;;  %s1880_s3 = inlined_call_operand.hbm [shape: f32[2,8,384], index: 3, kind: output, shape index: {}]  }
   0x1   :  { %v1474_v0 = vld [vmem:[%s1877_s0] sm:$0xff] }
   0x2   :  { %8 = vsyncpa [#allocation3], 0  ;;  %33 = vst [vmem:[#allocation1] ss:$4 sm:$0xff] %v1474_v0  ;;  %s1439_s14 = smov 127   ;;  %s1440_s15 = smov 126  }
   0x3   :  { %s1441_s16 = smov 110   ;;  %s1442_s17 = smov 109   ;;  %v1517_v32 = vld [vmem:[%s1877_s0 + $0x8] sm:$0xff]  ;;  %vm41_vm0 = vcmask 1041408   ;;  %v1542_v43 = vld [vmem:[%s1878_s1] sm:$0xf] }
   0x4   :  { %s1443_s18 = smov 108   ;;  %s1444_s19 = smov 92   ;;  %vm37_vm1 = vcmask 31744   ;;  %vm182_vm2 = vcmask 1031168   ;;  %vm107_vm3 = vcmask 1039360   ;;  %vm257_vm4 = vcmask 900096  }
   0x5   :  { %s1445_s22 = smov 91   ;;  %s1446_s23 = smov 90   ;;  %vm332_vm5 = vcmask 891904   ;;  %vm407_vm6 = vcmask 883712   ;;  %vm482_vm7 = vcmask 752640   ;;  %vm557_vm8 = vcmask 744448  }
   0x6   :  { %vm632_vm9 = vcmask 736256   ;;  %s1450_s20 = smov 24  }
   0x9   :  { %v1477_v1 = vld.sshfl [vmem:[#allocation1] sm:$0xff pattern:$0x73625140]  ;;  %v1479_v2 = vld.sshfl [vmem:[#allocation1 + $0x8] sm:$0xff pattern:$0x73625140] }
   0xa   :  { %v1481_v3 = vld.sshfl [vmem:[#allocation1 + $0x10] sm:$0xff pattern:$0x73625140]  ;;  %v42_v40 = vsel %vm41_vm0, %v1477_v1, 0  ;;  %v44_v41 = vsel %vm41_vm0, %v1479_v2, 0 }
   0xb   :  { %90 = vst [vmem:[#allocation1] ss:$4 sm:$0xff] %v1474_v0  ;;  %v46_v42 = vsel %vm41_vm0, %v1481_v3, 0  ;;  %55 = vmatpush.bf16.msra.mxu0 %v42_v40  ;;  %68 = vmatpush.bf16.msra.mxu1 %v44_v41 }
   0xc   :  { %81 = vmatpush.bf16.msra.mxu2 %v46_v42 }
   0xe   :  { %1344 = vmatmul.msk.bf16.vlgmr.msra.gmra.mxu0 %vm37_vm1, %v1542_v43  ;;  %1345 = vmatmul.msk.bf16.vlgmr.msra.gmra.mxu1 %vm37_vm1, %v1542_v43 }
   0xf   :  { %1346 = vmatmul.msk.bf16.vlgmr.msra.gmra.mxu2 %vm37_vm1, %v1542_v43 }
  0x12   :  { %v95_v4 = vld.sshfl [vmem:[#allocation1 + $0x10] sm:$0xff pattern:$0x73625140]  ;;  %v91_v5 = vld.sshfl [vmem:[#allocation1] sm:$0xff pattern:$0x73625140] }
  0x13   :  { %103 = vrot.lane.b32.xlu1 %v95_v4, %s1439_s14  ;;  %99 = vrot.lane.b32.xlu0 %v91_v5, %s1439_s14  ;;  %v97_v6 = vld.sshfl [vmem:[#allocation1 + $0x18] sm:$0xff pattern:$0x73625140]  ;;  %v93_v7 = vld.sshfl [vmem:[#allocation1 + $0x8] sm:$0xff pattern:$0x73625140] }
  0x14   :  { %165 = vst [vmem:[#allocation1] ss:$4 sm:$0xff] %v1474_v0 }
  0x1b   :  { %105 = vrot.lane.b32.xlu1 %v97_v6, %s1439_s14  ;;  %101 = vrot.lane.b32.xlu0 %v93_v7, %s1439_s14  ;;  %v172_v8 = vld.sshfl [vmem:[#allocation1 + $0x18] sm:$0xff pattern:$0x73625140]  ;;  %v168_v9 = vld.sshfl [vmem:[#allocation1 + $0x8] sm:$0xff pattern:$0x73625140] }
  0x1c   :  { %v170_v10 = vld.sshfl [vmem:[#allocation1 + $0x10] sm:$0xff pattern:$0x73625140]  ;;  %v166_v11 = vld.sshfl [vmem:[#allocation1] sm:$0xff pattern:$0x73625140] }
  0x1d   :  { %174 = vrot.lane.b32.xlu2 %v166_v11, %s1440_s15  ;;  %240 = vst [vmem:[#allocation1] ss:$4 sm:$0xff] %v1474_v0 }
  0x23   :  { %180 = vrot.lane.b32.xlu1 %v172_v8, %s1440_s15  ;;  %178 = vrot.lane.b32.xlu0 %v170_v10, %s1440_s15 }
  0x24   :  { %v245_v12 = vld.sshfl [vmem:[#allocation1 + $0x10] sm:$0xff pattern:$0x73625140]  ;;  %v247_v13 = vld.sshfl [vmem:[#allocation1 + $0x18] sm:$0xff pattern:$0x73625140] }
  0x25   :  { %v241_v14 = vld.sshfl [vmem:[#allocation1] sm:$0xff pattern:$0x73625140]  ;;  %v243_v15 = vld.sshfl [vmem:[#allocation1 + $0x8] sm:$0xff pattern:$0x73625140]  ;;  %176 = vrot.lane.b32.xlu2 %v168_v9, %s1440_s15 }
  0x26   :  { %315 = vst [vmem:[#allocation1] ss:$4 sm:$0xff] %v1474_v0 }
  0x2b   :  { %253 = vrot.lane.b32.xlu1 %v245_v12, %s1441_s16  ;;  %251 = vrot.lane.b32.xlu0 %v243_v15, %s1441_s16 }
  0x2d   :  { %v318_v16 = vld.sshfl [vmem:[#allocation1 + $0x8] sm:$0xff pattern:$0x73625140]  ;;  %v320_v17 = vld.sshfl [vmem:[#allocation1 + $0x10] sm:$0xff pattern:$0x73625140]  ;;  %249 = vrot.lane.b32.xlu2 %v241_v14, %s1441_s16 }
  0x2e   :  { %v316_v18 = vld.sshfl [vmem:[#allocation1] sm:$0xff pattern:$0x73625140]  ;;  %v322_v19 = vld.sshfl [vmem:[#allocation1 + $0x18] sm:$0xff pattern:$0x73625140] }
  0x2f   :  { %390 = vst [vmem:[#allocation1] ss:$4 sm:$0xff] %v1474_v0 }
  0x33   :  { %326 = vrot.lane.b32.xlu1 %v318_v16, %s1442_s17  ;;  %324 = vrot.lane.b32.xlu0 %v316_v18, %s1442_s17  ;;  %v1591_v16 = vld [vmem:[%s1878_s1 + $0x4] sm:$0xf] }
  0x35   :  { %255 = vrot.lane.b32.xlu2 %v247_v13, %s1441_s16 }
  0x36   :  { %v391_v20 = vld.sshfl [vmem:[#allocation1] sm:$0xff pattern:$0x73625140]  ;;  %v393_v21 = vld.sshfl [vmem:[#allocation1 + $0x8] sm:$0xff pattern:$0x73625140] }
  0x37   :  { %v397_v22 = vld.sshfl [vmem:[#allocation1 + $0x18] sm:$0xff pattern:$0x73625140]  ;;  %v395_v23 = vld.sshfl [vmem:[#allocation1 + $0x10] sm:$0xff pattern:$0x73625140] }
  0x38   :  { %465 = vst [vmem:[#allocation1] ss:$4 sm:$0xff] %v1474_v0 }
  0x3b   :  { %330 = vrot.lane.b32.xlu0 %v322_v19, %s1442_s17  ;;  %399 = vrot.lane.b32.xlu1 %v391_v20, %s1443_s18 }
  0x3d   :  { %328 = vrot.lane.b32.xlu2 %v320_v17, %s1442_s17 }
  0x3f   :  { %v470_v24 = vld.sshfl [vmem:[#allocation1 + $0x10] sm:$0xff pattern:$0x73625140]  ;;  %v472_v25 = vld.sshfl [vmem:[#allocation1 + $0x18] sm:$0xff pattern:$0x73625140] }
  0x40   :  { %v466_v26 = vld.sshfl [vmem:[#allocation1] sm:$0xff pattern:$0x73625140]  ;;  %v468_v27 = vld.sshfl [vmem:[#allocation1 + $0x8] sm:$0xff pattern:$0x73625140] }
  0x41   :  { %540 = vst [vmem:[#allocation1] ss:$4 sm:$0xff] %v1474_v0 }
  0x43   :  { %405 = vrot.lane.b32.xlu1 %v397_v22, %s1443_s18  ;;  %403 = vrot.lane.b32.xlu0 %v395_v23, %s1443_s18 }
  0x45   :  { %401 = vrot.lane.b32.xlu2 %v393_v21, %s1443_s18 }
  0x48   :  { %v543_v28 = vld.sshfl [vmem:[#allocation1 + $0x8] sm:$0xff pattern:$0x73625140]  ;;  %v545_v29 = vld.sshfl [vmem:[#allocation1 + $0x10] sm:$0xff pattern:$0x73625140] }
  0x49   :  { %v547_v30 = vld.sshfl [vmem:[#allocation1 + $0x18] sm:$0xff pattern:$0x73625140]  ;;  %v541_v31 = vld.sshfl [vmem:[#allocation1] sm:$0xff pattern:$0x73625140] }
  0x4a   :  { %615 = vst [vmem:[#allocation1] ss:$4 sm:$0xff] %v1474_v0  ;;  %v1571_v0 = vld [vmem:[%s1878_s1 + $0x8] sm:$0xf] }
  0x4b   :  { %478 = vrot.lane.b32.xlu1 %v470_v24, %s1444_s19  ;;  %476 = vrot.lane.b32.xlu0 %v468_v27, %s1444_s19 }
  0x4d   :  { %474 = vrot.lane.b32.xlu2 %v466_v26, %s1444_s19 }
  0x51   :  { %v616_v33 = vld.sshfl [vmem:[#allocation1] sm:$0xff pattern:$0x73625140]  ;;  %v618_v34 = vld.sshfl [vmem:[#allocation1 + $0x8] sm:$0xff pattern:$0x73625140] }
  0x52   :  { %v622_v35 = vld.sshfl [vmem:[#allocation1 + $0x18] sm:$0xff pattern:$0x73625140]  ;;  %v620_v36 = vld.sshfl [vmem:[#allocation1 + $0x10] sm:$0xff pattern:$0x73625140] }
  0x53   :  { %551 = vrot.lane.b32.xlu1 %v543_v28, %s1445_s22  ;;  %549 = vrot.lane.b32.xlu0 %v541_v31, %s1445_s22  ;;  %699 = vst [vmem:[#allocation1] ss:$4 sm:$0xff] %v1517_v32  ;;  %v1447_v31 = vmov 0  }
  0x54   :  { %1411 = vset.pattern.permute.xlu1 %v1447_v31  ;;  %1412 = vset.pattern.permute.xlu0 %v1447_v31 }
  0x55   :  { %480 = vrot.lane.b32.xlu2 %v472_v25, %s1444_s19 }
  0x5a   :  { %v1523_v37 = vld.sshfl [vmem:[#allocation1] sm:$0xff pattern:$0x73625140]  ;;  %v1525_v38 = vld.sshfl [vmem:[#allocation1 + $0x8] sm:$0xff pattern:$0x73625140] }
  0x5b   :  { %624 = vrot.lane.b32.xlu1 %v616_v33, %s1446_s23  ;;  %555 = vrot.lane.b32.xlu0 %v547_v30, %s1445_s22  ;;  %v1529_v39 = vld.sshfl [vmem:[#allocation1 + $0x10] sm:$0xff pattern:$0x73625140] }
  0x5c   :  { %751 = vst [vmem:[#allocation1] ss:$4 sm:$0xff] %v1517_v32 }
  0x5d   :  { %553 = vrot.lane.b32.xlu2 %v545_v29, %s1445_s22 }
  0x63   :  { %630 = vrot.lane.b32.xlu1 %v622_v35, %s1446_s23  ;;  %628 = vrot.lane.b32.xlu0 %v620_v36, %s1446_s23  ;;  %v752_v44 = vld.sshfl [vmem:[#allocation1] sm:$0xff pattern:$0x73625140]  ;;  %v754_v45 = vld.sshfl [vmem:[#allocation1 + $0x8] sm:$0xff pattern:$0x73625140] }
  0x64   :  { %v758_v46 = vld.sshfl [vmem:[#allocation1 + $0x18] sm:$0xff pattern:$0x73625140]  ;;  %v756_v47 = vld.sshfl [vmem:[#allocation1 + $0x10] sm:$0xff pattern:$0x73625140] }
  0x65   :  { %822 = vst [vmem:[#allocation1] ss:$4 sm:$0xff] %v1517_v32  ;;  %626 = vrot.lane.b32.xlu2 %v618_v34, %s1446_s23 }
  0x6b   :  { %764 = vrot.lane.b32.xlu1 %v756_v47, %s1439_s14  ;;  %762 = vrot.lane.b32.xlu0 %v754_v45, %s1439_s14  ;;  %v1622_v47 = vld [vmem:[%s1878_s1 + $0xc] sm:$0xf] }
  0x6c   :  { %v823_v48 = vld.sshfl [vmem:[#allocation1] sm:$0xff pattern:$0x73625140]  ;;  %v827_v49 = vld.sshfl [vmem:[#allocation1 + $0x10] sm:$0xff pattern:$0x73625140] }
  0x6d   :  { %v829_v50 = vld.sshfl [vmem:[#allocation1 + $0x18] sm:$0xff pattern:$0x73625140]  ;;  %v825_v51 = vld.sshfl [vmem:[#allocation1 + $0x8] sm:$0xff pattern:$0x73625140]  ;;  %760 = vrot.lane.b32.xlu2 %v752_v44, %s1439_s14 }
  0x6e   :  { %893 = vst [vmem:[#allocation1] ss:$4 sm:$0xff] %v1517_v32 }
  0x73   :  { %833 = vrot.lane.b32.xlu1 %v825_v51, %s1440_s15  ;;  %831 = vrot.lane.b32.xlu0 %v823_v48, %s1440_s15 }
  0x75   :  { %v896_v52 = vld.sshfl [vmem:[#allocation1 + $0x8] sm:$0xff pattern:$0x73625140]  ;;  %v898_v53 = vld.sshfl [vmem:[#allocation1 + $0x10] sm:$0xff pattern:$0x73625140]  ;;  %766 = vrot.lane.b32.xlu2 %v758_v46, %s1439_s14 }
  0x76   :  { %v894_v54 = vld.sshfl [vmem:[#allocation1] sm:$0xff pattern:$0x73625140]  ;;  %v900_v55 = vld.sshfl [vmem:[#allocation1 + $0x18] sm:$0xff pattern:$0x73625140] }
  0x77   :  { %964 = vst [vmem:[#allocation1] ss:$4 sm:$0xff] %v1517_v32  ;;  %v175_v56 = vpop.permute.xlu2 %174 }
  0x7b   :  { %902 = vrot.lane.b32.xlu1 %v894_v54, %s1441_s16  ;;  %837 = vrot.lane.b32.xlu0 %v829_v50, %s1440_s15 }
  0x7d   :  { %835 = vrot.lane.b32.xlu2 %v827_v49, %s1440_s15 }
  0x7e   :  { %v965_v57 = vld.sshfl [vmem:[#allocation1] sm:$0xff pattern:$0x73625140]  ;;  %v967_v58 = vld.sshfl [vmem:[#allocation1 + $0x8] sm:$0xff pattern:$0x73625140] }
  0x7f   :  { %v971_v59 = vld.sshfl [vmem:[#allocation1 + $0x18] sm:$0xff pattern:$0x73625140]  ;;  %v969_v60 = vld.sshfl [vmem:[#allocation1 + $0x10] sm:$0xff pattern:$0x73625140]  ;;  %v177_v61 = vpop.permute.xlu2 %176 }
  0x80   :  { %1035 = vst [vmem:[#allocation1] ss:$4 sm:$0xff] %v1517_v32  ;;  %v183_v62 = vsel %vm182_vm2, %v175_v56, %v177_v61 }
  0x81   :  { %v190_v63 = vsel %vm41_vm0, %v183_v62, 0  ;;  %v1649_v62 = vld [vmem:[%s1878_s1 + $0x10] sm:$0xf] }
  0x82   :  { %205 = vmatpush.bf16.msrb.mxu2 %v190_v63 }
  0x83   :  { %908 = vrot.lane.b32.xlu1 %v900_v55, %s1441_s16  ;;  %906 = vrot.lane.b32.xlu0 %v898_v53, %s1441_s16 }
  0x85   :  { %v104_v1 = vpop.permute.xlu1 %103  ;;  %v100_v2 = vpop.permute.xlu0 %99  ;;  %1350 = vmatmul.msk.bf16.vlgmr.msrb.gmra.mxu2 %vm37_vm1, %v1571_v0  ;;  %904 = vrot.lane.b32.xlu2 %v896_v52, %s1441_s16 }
  0x87   :  { %v1036_v3 = vld.sshfl [vmem:[#allocation1] sm:$0xff pattern:$0x73625140]  ;;  %v1040_v4 = vld.sshfl [vmem:[#allocation1 + $0x10] sm:$0xff pattern:$0x73625140]  ;;  %v250_v5 = vpop.permute.xlu2 %249 }
  0x88   :  { %v1042_v6 = vld.sshfl [vmem:[#allocation1 + $0x18] sm:$0xff pattern:$0x73625140]  ;;  %v1038_v7 = vld.sshfl [vmem:[#allocation1 + $0x8] sm:$0xff pattern:$0x73625140] }
  0x89   :  { %1106 = vst [vmem:[#allocation1] ss:$4 sm:$0xff] %v1517_v32 }
  0x8b   :  { %977 = vrot.lane.b32.xlu1 %v969_v60, %s1442_s17  ;;  %975 = vrot.lane.b32.xlu0 %v967_v58, %s1442_s17 }
  0x8d   :  { %v106_v8 = vpop.permute.xlu1 %105  ;;  %v102_v9 = vpop.permute.xlu0 %101  ;;  %973 = vrot.lane.b32.xlu2 %v965_v57, %s1442_s17 }
  0x8e   :  { %v108_v10 = vsel %vm107_vm3, %v100_v2, %v102_v9  ;;  %v109_v11 = vsel %vm107_vm3, %v102_v9, %v104_v1  ;;  %v110_v12 = vsel %vm107_vm3, %v104_v1, %v106_v8  ;;  %v25_v8 = vld [vmem:[%s1879_s2] sm:$0xff] }
  0x8f   :  { %v115_v13 = vsel %vm41_vm0, %v108_v10, 0  ;;  %v118_v14 = vsel %vm41_vm0, %v109_v11, 0  ;;  %v121_v15 = vsel %vm41_vm0, %v110_v12, 0  ;;  %v256_v17 = vpop.permute.xlu2 %255 }
  0x90   :  { %130 = vmatpush.bf16.msra.mxu3 %v115_v13  ;;  %143 = vmatpush.bf16.msrb.mxu0 %v118_v14  ;;  %v1109_v18 = vld.sshfl [vmem:[#allocation1 + $0x8] sm:$0xff pattern:$0x73625140]  ;;  %v1111_v19 = vld.sshfl [vmem:[#allocation1 + $0x10] sm:$0xff pattern:$0x73625140] }
  0x91   :  { %156 = vmatpush.bf16.msrb.mxu1 %v121_v15  ;;  %v1107_v20 = vld.sshfl [vmem:[#allocation1] sm:$0xff pattern:$0x73625140]  ;;  %v1113_v21 = vld.sshfl [vmem:[#allocation1 + $0x18] sm:$0xff pattern:$0x73625140] }
  0x92   :  { %1177 = vst [vmem:[#allocation1] ss:$4 sm:$0xff] %v1517_v32 }
  0x93   :  { %1046 = vrot.lane.b32.xlu1 %v1038_v7, %s1443_s18  ;;  %1347 = vmatmul.msk.bf16.vlgmr.msra.gmra.mxu3 %vm37_vm1, %v1591_v16 }
  0x94   :  { %1348 = vmatmul.msk.bf16.vlgmr.msrb.gmra.mxu0 %vm37_vm1, %v1591_v16  ;;  %1349 = vmatmul.msk.bf16.vlgmr.msrb.gmra.mxu1 %vm37_vm1, %v1591_v16 }
  0x95   :  { %v181_v22 = vpop.permute.xlu1 %180  ;;  %v179_v23 = vpop.permute.xlu0 %178  ;;  %1044 = vrot.lane.b32.xlu0 %v1036_v3, %s1443_s18  ;;  %979 = vrot.lane.b32.xlu2 %v971_v59, %s1442_s17 }
  0x96   :  { %v185_v24 = vsel %vm182_vm2, %v179_v23, %v181_v22  ;;  %v184_v25 = vsel %vm182_vm2, %v177_v61, %v179_v23 }
  0x97   :  { %v196_v26 = vsel %vm41_vm0, %v185_v24, 0  ;;  %v193_v27 = vsel %vm41_vm0, %v184_v25, 0  ;;  %v329_v28 = vpop.permute.xlu2 %328 }
  0x98   :  { %218 = vmatpush.bf16.msrb.mxu3 %v193_v27  ;;  %231 = vmatpush.bf16.msra.mxu0 %v196_v26 }
  0x99   :  { %v1178_v29 = vld.sshfl [vmem:[#allocation1] sm:$0xff pattern:$0x73625140]  ;;  %v1180_v30 = vld.sshfl [vmem:[#allocation1 + $0x8] sm:$0xff pattern:$0x73625140] }
  0x9a   :  { %v1607_v33 = vld.sshfl [vmem:[#allocation1 + $0x18] sm:$0xff pattern:$0x73625140]  ;;  %v1182_v34 = vld.sshfl [vmem:[#allocation1 + $0x10] sm:$0xff pattern:$0x73625140] }
  0x9b   :  { %1115 = vrot.lane.b32.xlu1 %v1107_v20, %s1444_s19  ;;  %1248 = vst [vmem:[#allocation1] ss:$4 sm:$0xff] %v1517_v32  ;;  %v1680_v20 = vld [vmem:[%s1878_s1 + $0x14] sm:$0xf] }
  0x9d   :  { %v254_v35 = vpop.permute.xlu1 %253  ;;  %v252_v36 = vpop.permute.xlu0 %251  ;;  %1050 = vrot.lane.b32.xlu0 %v1042_v6, %s1443_s18  ;;  %1048 = vrot.lane.b32.xlu2 %v1040_v4, %s1443_s18  ;;  %s1332_s18 = sshll.u32 %s1880_s3, 4  ;;  %s1333_s18 = int_to_ptr.hbm [resolvable:$true] %s1332_s18 }
  0x9e   :  { %v259_v40 = vsel %vm257_vm4, %v252_v36, %v254_v35  ;;  %v258_v41 = vsel %vm257_vm4, %v250_v5, %v252_v36  ;;  %v260_v42 = vsel %vm257_vm4, %v254_v35, %v256_v17 }
  0x9f   :  { %v268_v44 = vsel %vm41_vm0, %v259_v40, 0  ;;  %v265_v45 = vsel %vm41_vm0, %v258_v41, 0  ;;  %v271_v46 = vsel %vm41_vm0, %v260_v42, 0  ;;  %v402_v32 = vpop.permute.xlu2 %401  ;;  %v1707_v41 = vld [vmem:[%s1878_s1 + $0x1c] sm:$0xf]  ;;  %v703_v42 = vsel %vm41_vm0, %v1523_v37, 0 }
  0xa0   :  { %280 = vmatpush.bf16.msra.mxu1 %v265_v45  ;;  %293 = vmatpush.bf16.msra.mxu2 %v268_v44  ;;  %v705_v44 = vsel %vm41_vm0, %v1525_v38, 0  ;;  %v707_v38 = vsel %vm41_vm0, %v1529_v39, 0 }
  0xa1   :  { %306 = vmatpush.bf16.msra.mxu3 %v271_v46 }
  0xa2   :  { %v1251_v61 = vld.sshfl [vmem:[#allocation1 + $0x8] sm:$0xff pattern:$0x73625140]  ;;  %v1249_v63 = vld.sshfl [vmem:[#allocation1] sm:$0xff pattern:$0x73625140] }
  0xa3   :  { %1121 = vrot.lane.b32.xlu1 %v1113_v21, %s1444_s19  ;;  %1351 = vmatmul.msk.bf16.vlgmr.msrb.gmra.mxu3 %vm37_vm1, %v1571_v0  ;;  %v1255_v9 = vld.sshfl [vmem:[#allocation1 + $0x18] sm:$0xff pattern:$0x73625140]  ;;  %v1253_v31 = vld.sshfl [vmem:[#allocation1 + $0x10] sm:$0xff pattern:$0x73625140] }
  0xa4   :  { %1352 = vmatmul.msk.bf16.vlgmr.msra.gmra.mxu0 %vm37_vm1, %v1571_v0  ;;  %1353 = vmatmul.msk.bf16.vlgmr.msra.gmra.mxu1 %vm37_vm1, %v1622_v47  ;;  %v1685_v21 = vld [vmem:[%s1878_s1 + $0x18] sm:$0xf] }
  0xa5   :  { %v327_v48 = vpop.permute.xlu1 %326  ;;  %v325_v49 = vpop.permute.xlu0 %324  ;;  %1354 = vmatmul.msk.bf16.vlgmr.msra.gmra.mxu2 %vm37_vm1, %v1622_v47  ;;  %1119 = vrot.lane.b32.xlu0 %v1111_v19, %s1444_s19 }
  0xa6   :  { %v333_v50 = vsel %vm332_vm5, %v325_v49, %v327_v48  ;;  %v334_v51 = vsel %vm332_vm5, %v327_v48, %v329_v28  ;;  %1117 = vrot.lane.b32.xlu2 %v1109_v18, %s1444_s19  ;;  %s1449_s19 = smov 384  }
  0xa7   :  { %v340_v52 = vsel %vm41_vm0, %v333_v50, 0  ;;  %v343_v53 = vsel %vm41_vm0, %v334_v51, 0  ;;  %v475_v54 = vpop.permute.xlu2 %474 }
  0xa8   :  { %355 = vmatpush.bf16.msrb.mxu0 %v340_v52  ;;  %368 = vmatpush.bf16.msrb.mxu1 %v343_v53 }
  0xab   :  { %1190 = vrot.lane.b32.xlu1 %v1182_v34, %s1445_s22 }
  0xad   :  { %v331_v55 = vpop.permute.xlu0 %330  ;;  %v400_v56 = vpop.permute.xlu1 %399  ;;  %1188 = vrot.lane.b32.xlu0 %v1180_v30, %s1445_s22 }
  0xae   :  { %v335_v57 = vsel %vm332_vm5, %v329_v28, %v331_v55  ;;  %v408_v58 = vsel %vm407_vm6, %v400_v56, %v402_v32  ;;  %1186 = vrot.lane.b32.xlu2 %v1178_v29, %s1445_s22  ;;  %v1730_v55 = vpop.f32.mrf.mxu1 }
  0xaf   :  { %v346_v59 = vsel %vm41_vm0, %v335_v57, 0  ;;  %v415_v60 = vsel %vm41_vm0, %v408_v58, 0  ;;  %v481_v1 = vpop.permute.xlu2 %480  ;;  %v1738_v58 = vld [vmem:[%s1878_s1 + $0x20] sm:$0xf]  ;;  %s1448_s1 = smov [#allocation2]  }
  0xb0   :  { %381 = vmatpush.bf16.msrb.mxu2 %v346_v59  ;;  %430 = vmatpush.bf16.msrb.mxu3 %v415_v60  ;;  %s1330_s15 = sshll.u32 %s1448_s1, 4  ;;  %s1331_s15 = int_to_ptr.vmem [resolvable:$true] %s1330_s15 }
  0xb3   :  { %1259 = vrot.lane.b32.xlu1 %v1251_v61, %s1446_s23  ;;  %1355 = vmatmul.msk.bf16.vlgmr.msra.gmra.mxu3 %vm37_vm1, %v1622_v47 }
  0xb4   :  { %1356 = vmatmul.msk.bf16.vlgmr.msrb.gmra.mxu0 %vm37_vm1, %v1649_v62  ;;  %1357 = vmatmul.msk.bf16.vlgmr.msrb.gmra.mxu1 %vm37_vm1, %v1649_v62 }
  0xb5   :  { %v406_v2 = vpop.permute.xlu1 %405  ;;  %1358 = vmatmul.msk.bf16.vlgmr.msrb.gmra.mxu2 %vm37_vm1, %v1649_v62  ;;  %v404_v3 = vpop.permute.xlu0 %403  ;;  %1257 = vrot.lane.b32.xlu0 %v1249_v63, %s1446_s23 }
  0xb6   :  { %v409_v4 = vsel %vm407_vm6, %v402_v32, %v404_v3  ;;  %v410_v5 = vsel %vm407_vm6, %v404_v3, %v406_v2  ;;  %1192 = vrot.lane.b32.xlu2 %v1607_v33, %s1445_s22 }
  0xb7   :  { %v418_v6 = vsel %vm41_vm0, %v409_v4, 0  ;;  %v421_v7 = vsel %vm41_vm0, %v410_v5, 0  ;;  %v554_v15 = vpop.permute.xlu2 %553  ;;  %v72_v5 = vpop.f32.mrf.mxu1 }
  0xb8   :  { %443 = vmatpush.bf16.msra.mxu0 %v418_v6  ;;  %456 = vmatpush.bf16.msra.mxu1 %v421_v7 }
  0xbb   :  { %29 = vperm.xlu1 %1411, %v25_v8   ;;  %v1754_v8 = vpop.f32.mrf.mxu2 }
  0xbd   :  { %v479_v10 = vpop.permute.xlu1 %478  ;;  %v477_v11 = vpop.permute.xlu0 %476  ;;  %1263 = vrot.lane.b32.xlu0 %v1255_v9, %s1446_s23 }
  0xbe   :  { %v483_v12 = vsel %vm482_vm7, %v475_v54, %v477_v11  ;;  %v484_v13 = vsel %vm482_vm7, %v477_v11, %v479_v10  ;;  %v485_v14 = vsel %vm482_vm7, %v479_v10, %v481_v1  ;;  %1261 = vrot.lane.b32.xlu2 %v1253_v31, %s1446_s23  ;;  %v1728_v54 = vpop.f32.mrf.mxu0 }
  0xbf   :  { %v490_v17 = vsel %vm41_vm0, %v483_v12, 0  ;;  %v493_v18 = vsel %vm41_vm0, %v484_v13, 0  ;;  %v496_v19 = vsel %vm41_vm0, %v485_v14, 0  ;;  %v627_v26 = vpop.permute.xlu2 %626 }
  0xc0   :  { %505 = vmatpush.bf16.msra.mxu2 %v490_v17  ;;  %518 = vmatpush.bf16.msra.mxu3 %v493_v18 }
  0xc1   :  { %531 = vmatpush.bf16.msrb.mxu0 %v496_v19 }
  0xc3   :  { %1359 = vmatmul.msk.bf16.vlgmr.msrb.gmra.mxu3 %vm37_vm1, %v1680_v20  ;;  %v85_v13 = vpop.f32.mrf.mxu2 }
  0xc4   :  { %1360 = vmatmul.msk.bf16.vlgmr.msra.gmra.mxu0 %vm37_vm1, %v1680_v20  ;;  %1361 = vmatmul.msk.bf16.vlgmr.msra.gmra.mxu1 %vm37_vm1, %v1680_v20 }
  0xc5   :  { %v552_v22 = vpop.permute.xlu1 %551  ;;  %1362 = vmatmul.msk.bf16.vlgmr.msra.gmra.mxu2 %vm37_vm1, %v1685_v21  ;;  %v550_v23 = vpop.permute.xlu0 %549 }
  0xc6   :  { %v559_v24 = vsel %vm557_vm8, %v552_v22, %v554_v15  ;;  %v558_v25 = vsel %vm557_vm8, %v550_v23, %v552_v22  ;;  %v59_v4 = vpop.f32.mrf.mxu0 }
  0xc7   :  { %v568_v27 = vsel %vm41_vm0, %v559_v24, 0  ;;  %v565_v28 = vsel %vm41_vm0, %v558_v25, 0  ;;  %v761_v35 = vpop.permute.xlu2 %760 }
  0xc8   :  { %580 = vmatpush.bf16.msrb.mxu1 %v565_v28  ;;  %593 = vmatpush.bf16.msrb.mxu2 %v568_v27 }
  0xcd   :  { %v625_v29 = vpop.permute.xlu1 %624  ;;  %v556_v30 = vpop.permute.xlu0 %555 }
  0xce   :  { %v560_v33 = vsel %vm557_vm8, %v554_v15, %v556_v30  ;;  %v633_v34 = vsel %vm632_vm9, %v625_v29, %v627_v26 }
  0xcf   :  { %v571_v36 = vsel %vm41_vm0, %v560_v33, 0  ;;  %v640_v40 = vsel %vm41_vm0, %v633_v34, 0  ;;  %v767_v50 = vpop.permute.xlu2 %766 }
  0xd0   :  { %606 = vmatpush.bf16.msrb.mxu3 %v571_v36  ;;  %655 = vmatpush.bf16.msra.mxu0 %v640_v40 }
  0xd3   :  { %1363 = vmatmul.msk.bf16.vlgmr.msra.gmra.mxu3 %vm37_vm1, %v1685_v21 }
  0xd4   :  { %1364 = vmatmul.msk.bf16.vlgmr.msrb.gmra.mxu0 %vm37_vm1, %v1685_v21  ;;  %1365 = vmatmul.msk.bf16.vlgmr.msrb.gmra.mxu1 %vm37_vm1, %v1707_v41 }
  0xd5   :  { %v631_v45 = vpop.permute.xlu1 %630  ;;  %1366 = vmatmul.msk.bf16.vlgmr.msrb.gmra.mxu2 %vm37_vm1, %v1707_v41  ;;  %v629_v46 = vpop.permute.xlu0 %628  ;;  %716 = vmatpush.bf16.msra.mxu3 %v703_v42 }
  0xd6   :  { %v635_v37 = vsel %vm632_vm9, %v629_v46, %v631_v45  ;;  %v634_v32 = vsel %vm632_vm9, %v627_v26, %v629_v46  ;;  %729 = vmatpush.bf16.msrb.mxu0 %v705_v44 }
  0xd7   :  { %v646_v48 = vsel %vm41_vm0, %v635_v37, 0  ;;  %v643_v49 = vsel %vm41_vm0, %v634_v32, 0  ;;  %v836_v60 = vpop.permute.xlu2 %835 }
  0xd8   :  { %668 = vmatpush.bf16.msra.mxu1 %v643_v49  ;;  %681 = vmatpush.bf16.msra.mxu2 %v646_v48 }
  0xdc   :  { %742 = vmatpush.bf16.msrb.mxu1 %v707_v38 }
  0xdd   :  { %v765_v51 = vpop.permute.xlu1 %764  ;;  %v763_v52 = vpop.permute.xlu0 %762 }
  0xde   :  { %v768_v53 = vsel %vm107_vm3, %v761_v35, %v763_v52  ;;  %v769_v56 = vsel %vm107_vm3, %v763_v52, %v765_v51  ;;  %v770_v57 = vsel %vm107_vm3, %v765_v51, %v767_v50 }
  0xdf   :  { %v772_v39 = vsel %vm41_vm0, %v768_v53, 0  ;;  %v775_v59 = vsel %vm41_vm0, %v769_v56, 0  ;;  %v778_v61 = vsel %vm41_vm0, %v770_v57, 0  ;;  %v905_v9 = vpop.permute.xlu2 %904 }
  0xe0   :  { %787 = vmatpush.bf16.msrb.mxu2 %v772_v39 }
  0xe3   :  { %1367 = vmatmul.msk.bf16.vlgmr.msrb.gmra.mxu3 %vm37_vm1, %v1707_v41 }
  0xe4   :  { %1368 = vmatmul.msk.bf16.vlgmr.msra.gmra.mxu0 %vm37_vm1, %v1738_v58  ;;  %1369 = vmatmul.msk.bf16.vlgmr.msra.gmra.mxu1 %vm37_vm1, %v1738_v58 }
  0xe5   :  { %v834_v63 = vpop.permute.xlu1 %833  ;;  %1370 = vmatmul.msk.bf16.vlgmr.msra.gmra.mxu2 %vm37_vm1, %v1738_v58  ;;  %800 = vmatpush.bf16.msrb.mxu3 %v775_v59  ;;  %v832_v1 = vpop.permute.xlu0 %831 }
  0xe6   :  { %813 = vmatpush.bf16.msra.mxu0 %v778_v61  ;;  %v840_v2 = vsel %vm182_vm2, %v834_v63, %v836_v60  ;;  %v839_v3 = vsel %vm182_vm2, %v832_v1, %v834_v63 }
  0xe7   :  { %v846_v6 = vsel %vm41_vm0, %v840_v2, 0  ;;  %v843_v7 = vsel %vm41_vm0, %v839_v3, 0  ;;  %v974_v18 = vpop.permute.xlu2 %973 }
  0xe8   :  { %858 = vmatpush.bf16.msra.mxu1 %v843_v7  ;;  %871 = vmatpush.bf16.msra.mxu2 %v846_v6 }
  0xed   :  { %v903_v10 = vpop.permute.xlu1 %902  ;;  %v838_v11 = vpop.permute.xlu0 %837 }
  0xee   :  { %v841_v12 = vsel %vm182_vm2, %v836_v60, %v838_v11  ;;  %v910_v14 = vsel %vm257_vm4, %v903_v10, %v905_v9 }
  0xef   :  { %v849_v15 = vsel %vm41_vm0, %v841_v12, 0  ;;  %v914_v17 = vsel %vm41_vm0, %v910_v14, 0  ;;  %v980_v27 = vpop.permute.xlu2 %979 }
  0xf3   :  { %1372 = vmatmul.msk.bf16.vlgmr.msra.gmra.mxu3 %vm37_vm1, %v1542_v43 }
  0xf4   :  { %1373 = vmatmul.msk.bf16.vlgmr.msrb.gmra.mxu0 %vm37_vm1, %v1542_v43  ;;  %1374 = vmatmul.msk.bf16.vlgmr.msrb.gmra.mxu1 %vm37_vm1, %v1542_v43 }
  0xf5   :  { %v909_v19 = vpop.permute.xlu1 %908  ;;  %1375 = vmatmul.msk.bf16.vlgmr.msrb.gmra.mxu2 %vm37_vm1, %v1591_v16  ;;  %884 = vmatpush.bf16.msra.mxu3 %v849_v15  ;;  %v907_v22 = vpop.permute.xlu0 %906 }
  0xf6   :  { %v912_v23 = vsel %vm257_vm4, %v907_v22, %v909_v19  ;;  %v911_v24 = vsel %vm257_vm4, %v905_v9, %v907_v22  ;;  %929 = vmatpush.bf16.msrb.mxu0 %v914_v17 }
  0xf7   :  { %v920_v25 = vsel %vm41_vm0, %v912_v23, 0  ;;  %v917_v26 = vsel %vm41_vm0, %v911_v24, 0  ;;  %v1049_v36 = vpop.permute.xlu2 %1048 }
  0xf8   :  { %942 = vmatpush.bf16.msrb.mxu1 %v917_v26  ;;  %955 = vmatpush.bf16.msrb.mxu2 %v920_v25 }
  0xfd   :  { %v978_v43 = vpop.permute.xlu1 %977  ;;  %v976_v28 = vpop.permute.xlu0 %975 }
  0xfe   :  { %v981_v29 = vsel %vm332_vm5, %v974_v18, %v976_v28  ;;  %v982_v30 = vsel %vm332_vm5, %v976_v28, %v978_v43  ;;  %v983_v31 = vsel %vm332_vm5, %v978_v43, %v980_v27 }
  0xff   :  { %v985_v33 = vsel %vm41_vm0, %v981_v29, 0  ;;  %v988_v34 = vsel %vm41_vm0, %v982_v30, 0  ;;  %v991_v35 = vsel %vm41_vm0, %v983_v31, 0 }
 0x100   :  { %v1118_v37 = vpop.permute.xlu2 %1117 }
 0x103   :  { %1376 = vmatmul.msk.bf16.vlgmr.msrb.gmra.mxu3 %vm37_vm1, %v1591_v16 }
 0x104   :  { %1377 = vmatmul.msk.bf16.vlgmr.msra.gmra.mxu0 %vm37_vm1, %v1591_v16  ;;  %1378 = vmatmul.msk.bf16.vlgmr.msra.gmra.mxu1 %vm37_vm1, %v1571_v0 }
 0x105   :  { %v1047_v40 = vpop.permute.xlu1 %1046  ;;  %1379 = vmatmul.msk.bf16.vlgmr.msra.gmra.mxu2 %vm37_vm1, %v1571_v0  ;;  %1000 = vmatpush.bf16.msrb.mxu3 %v985_v33 }
 0x106   :  { %1013 = vmatpush.bf16.msra.mxu0 %v988_v34  ;;  %1026 = vmatpush.bf16.msra.mxu1 %v991_v35  ;;  %v1053_v32 = vsel %vm407_vm6, %v1047_v40, %v1049_v36 }
 0x107   :  { %v1045_v42 = vpop.permute.xlu0 %1044  ;;  %v1059_v53 = vsel %vm41_vm0, %v1053_v32, 0 }
 0x108   :  { %v1786_v44 = vpop.f32.mrf.mxu2  ;;  %v1052_v45 = vsel %vm407_vm6, %v1045_v42, %v1047_v40 }
 0x109   :  { %v1056_v46 = vsel %vm41_vm0, %v1052_v45, 0 }
 0x10a   :  { %1071 = vmatpush.bf16.msra.mxu2 %v1056_v46 }
 0x10d   :  { %v1116_v16 = vpop.permute.xlu1 %1115 }
 0x10e   :  { %v1123_v50 = vsel %vm482_vm7, %v1116_v16, %v1118_v37 }
 0x10f   :  { %v1051_v38 = vpop.permute.xlu0 %1050  ;;  %v1127_v39 = vsel %vm41_vm0, %v1123_v50, 0 }
 0x110   :  { %v209_v48 = vpop.f32.mrf.mxu2  ;;  %v1054_v49 = vsel %vm407_vm6, %v1049_v36, %v1051_v38 }
 0x111   :  { %v1793_v51 = vpop.f32.mrf.mxu0  ;;  %v158_v52 = vpop.f32.mrf.mxu1  ;;  %v1062_v56 = vsel %vm41_vm0, %v1054_v49, 0 }
 0x113   :  { %1380 = vmatmul.msk.bf16.vlgmr.msra.gmra.mxu3 %vm37_vm1, %v1571_v0  ;;  %v1187_v0 = vpop.permute.xlu2 %1186 }
 0x114   :  { %1381 = vmatmul.msk.bf16.vlgmr.msrb.gmra.mxu0 %vm37_vm1, %v1622_v47  ;;  %1382 = vmatmul.msk.bf16.vlgmr.msrb.gmra.mxu1 %vm37_vm1, %v1622_v47 }
 0x115   :  { %v1122_v57 = vpop.permute.xlu1 %1121  ;;  %1383 = vmatmul.msk.bf16.vlgmr.msrb.gmra.mxu2 %vm37_vm1, %v1622_v47  ;;  %1084 = vmatpush.bf16.msra.mxu3 %v1059_v53 }
 0x116   :  { %v1806_v59 = vpop.f32.mrf.mxu3  ;;  %1097 = vmatpush.bf16.msrb.mxu0 %v1062_v56  ;;  %1142 = vmatpush.bf16.msrb.mxu1 %v1127_v39 }
 0x117   :  { %v1120_v60 = vpop.permute.xlu0 %1119 }
 0x118   :  { %v1124_v61 = vsel %vm482_vm7, %v1118_v37, %v1120_v60  ;;  %v1125_v6 = vsel %vm482_vm7, %v1120_v60, %v1122_v57 }
 0x119   :  { %v147_v63 = vpop.f32.mrf.mxu0  ;;  %v160_v1 = vpop.f32.mrf.mxu1  ;;  %v1130_v2 = vsel %vm41_vm0, %v1124_v61, 0  ;;  %v1133_v13 = vsel %vm41_vm0, %v1125_v6, 0 }
 0x11a   :  { %1155 = vmatpush.bf16.msrb.mxu2 %v1130_v2 }
 0x11b   :  { %v1193_v5 = vpop.permute.xlu2 %1192 }
 0x11d   :  { %v1191_v3 = vpop.permute.xlu1 %1190 }
 0x11e   :  { %v134_v4 = vpop.f32.mrf.mxu3  ;;  %v1196_v12 = vsel %vm557_vm8, %v1191_v3, %v1193_v5 }
 0x11f   :  { %v1189_v47 = vpop.permute.xlu0 %1188  ;;  %v1204_v17 = vsel %vm41_vm0, %v1196_v12, 0 }
 0x120   :  { %v1194_v7 = vsel %vm557_vm8, %v1187_v0, %v1189_v47  ;;  %v1195_v9 = vsel %vm557_vm8, %v1189_v47, %v1191_v3 }
 0x121   :  { %v1813_v10 = vpop.f32.mrf.mxu0  ;;  %v1815_v11 = vpop.f32.mrf.mxu1  ;;  %v1198_v14 = vsel %vm41_vm0, %v1194_v7, 0  ;;  %v1201_v15 = vsel %vm41_vm0, %v1195_v9, 0 }
 0x123   :  { %1384 = vmatmul.msk.bf16.vlgmr.msrb.gmra.mxu3 %vm37_vm1, %v1649_v62  ;;  %v1262_v27 = vpop.permute.xlu2 %1261 }
 0x124   :  { %1385 = vmatmul.msk.bf16.vlgmr.msra.gmra.mxu0 %vm37_vm1, %v1649_v62  ;;  %1386 = vmatmul.msk.bf16.vlgmr.msra.gmra.mxu1 %vm37_vm1, %v1649_v62 }
 0x125   :  { %v1260_v18 = vpop.permute.xlu1 %1259  ;;  %1387 = vmatmul.msk.bf16.vlgmr.msra.gmra.mxu2 %vm37_vm1, %v1680_v20  ;;  %1168 = vmatpush.bf16.msrb.mxu3 %v1133_v13 }
 0x126   :  { %v220_v19 = vpop.f32.mrf.mxu3  ;;  %1213 = vmatpush.bf16.msra.mxu0 %v1198_v14  ;;  %1226 = vmatpush.bf16.msra.mxu1 %v1201_v15  ;;  %v1266_v33 = vsel %vm632_vm9, %v1260_v18, %v1262_v27 }
 0x127   :  { %1239 = vmatpush.bf16.msra.mxu2 %v1204_v17  ;;  %v1258_v22 = vpop.permute.xlu0 %1257  ;;  %v1272_v42 = vsel %vm41_vm0, %v1266_v33, 0 }
 0x128   :  { %v295_v23 = vpop.f32.mrf.mxu2  ;;  %v1265_v28 = vsel %vm632_vm9, %v1258_v22, %v1260_v18 }
 0x129   :  { %v235_v24 = vpop.f32.mrf.mxu0  ;;  %v284_v25 = vpop.f32.mrf.mxu1  ;;  %v1269_v40 = vsel %vm41_vm0, %v1265_v28, 0 }
 0x12d   :  { %v1830_v26 = vpop.permute.xlu1 %29 }
 0x12e   :  { %v222_v43 = vpop.f32.mrf.mxu3  ;;  %v89_v62 = vadd.f32 %v1754_v8, %v1830_v26  ;;  %v87_v50 = vadd.f32 %v1728_v54, %v1830_v26 }
 0x12f   :  { %v1264_v29 = vpop.permute.xlu0 %1263 }
 0x130   :  { %v297_v30 = vpop.f32.mrf.mxu2  ;;  %v164_v31 = vadd.f32 %v158_v52, %v89_v62  ;;  %v1267_v34 = vsel %vm632_vm9, %v1262_v27, %v1264_v29  ;;  %v88_v52 = vadd.f32 %v1730_v55, %v1830_v26 }
 0x131   :  { %v357_v35 = vpop.f32.mrf.mxu0  ;;  %v370_v36 = vpop.f32.mrf.mxu1  ;;  %v1275_v8 = vsel %vm41_vm0, %v1267_v34, 0 }
 0x132   :  { %v163_v57 = vadd.f32 %v1793_v51, %v88_v52  ;;  %v239_v47 = vadd.f32 %v1813_v10, %v164_v31 }
 0x133   :  { %1388 = vmatmul.msk.bf16.vlgmr.msra.gmra.mxu3 %vm37_vm1, %v1680_v20 }
 0x134   :  { %1389 = vmatmul.msk.bf16.vlgmr.msrb.gmra.mxu0 %vm37_vm1, %v1680_v20  ;;  %1390 = vmatmul.msk.bf16.vlgmr.msrb.gmra.mxu1 %vm37_vm1, %v1685_v21  ;;  %v238_v61 = vadd.f32 %v220_v19, %v163_v57 }
 0x135   :  { %1391 = vmatmul.msk.bf16.vlgmr.msrb.gmra.mxu2 %vm37_vm1, %v1685_v21  ;;  %1284 = vmatpush.bf16.msra.mxu3 %v1269_v40 }
 0x136   :  { %v308_v45 = vpop.f32.mrf.mxu3  ;;  %1297 = vmatpush.bf16.msrb.mxu0 %v1272_v42  ;;  %1310 = vmatpush.bf16.msrb.mxu1 %v1275_v8  ;;  %v313_v55 = vadd.f32 %v295_v23, %v238_v61 }
 0x137   :  { %v314_v9 = vadd.f32 %v308_v45, %v239_v47 }
 0x138   :  { %v383_v46 = vpop.f32.mrf.mxu2  ;;  %v388_v2 = vadd.f32 %v370_v36, %v313_v55 }
 0x139   :  { %v359_v16 = vpop.f32.mrf.mxu0  ;;  %v372_v37 = vpop.f32.mrf.mxu1  ;;  %v389_v17 = vadd.f32 %v383_v46, %v314_v9 }
 0x13e   :  { %v310_v32 = vpop.f32.mrf.mxu3 }
 0x140   :  { %v385_v38 = vpop.f32.mrf.mxu2 }
 0x141   :  { %v445_v48 = vpop.f32.mrf.mxu0  ;;  %v458_v49 = vpop.f32.mrf.mxu1 }
 0x142   :  { %v463_v5 = vadd.f32 %v445_v48, %v388_v2  ;;  %v464_v23 = vadd.f32 %v458_v49, %v389_v17 }
 0x143   :  { %1392 = vmatmul.msk.bf16.vlgmr.msrb.gmra.mxu3 %vm37_vm1, %v1685_v21  ;;  %v162_v21 = vadd.f32 %v1806_v59, %v87_v50 }
 0x144   :  { %1393 = vmatmul.msk.bf16.vlgmr.msra.gmra.mxu0 %vm37_vm1, %v1707_v41  ;;  %1394 = vmatmul.msk.bf16.vlgmr.msra.gmra.mxu1 %vm37_vm1, %v1707_v41 }
 0x145   :  { %1395 = vmatmul.msk.bf16.vlgmr.msra.gmra.mxu2 %vm37_vm1, %v1707_v41  ;;  %v237_v60 = vadd.f32 %v1786_v44, %v162_v21 }
 0x146   :  { %v432_v20 = vpop.f32.mrf.mxu3 }
 0x147   :  { %v312_v54 = vadd.f32 %v1815_v11, %v237_v60 }
 0x148   :  { %v507_v53 = vpop.f32.mrf.mxu2 }
 0x149   :  { %v447_v56 = vpop.f32.mrf.mxu0  ;;  %v460_v39 = vpop.f32.mrf.mxu1  ;;  %v387_v59 = vadd.f32 %v357_v35, %v312_v54 }
 0x14b   :  { %v462_v6 = vadd.f32 %v432_v20, %v387_v59 }
 0x14d   :  { %v537_v11 = vadd.f32 %v507_v53, %v462_v6 }
 0x14e   :  { %v434_v0 = vpop.f32.mrf.mxu3 }
 0x150   :  { %v509_v63 = vpop.f32.mrf.mxu2 }
 0x151   :  { %v533_v41 = vpop.f32.mrf.mxu0  ;;  %v582_v1 = vpop.f32.mrf.mxu1 }
 0x152   :  { %v612_v13 = vadd.f32 %v582_v1, %v537_v11  ;;  %v539_v27 = vadd.f32 %v533_v41, %v464_v23 }
 0x153   :  { %1396 = vmatmul.msk.bf16.vlgmr.msra.gmra.mxu3 %vm37_vm1, %v1738_v58 }
 0x154   :  { %1397 = vmatmul.msk.bf16.vlgmr.msrb.gmra.mxu0 %vm37_vm1, %v1738_v58  ;;  %1398 = vmatmul.msk.bf16.vlgmr.msrb.gmra.mxu1 %vm37_vm1, %v1738_v58 }
 0x156   :  { %v520_v51 = vpop.f32.mrf.mxu3 }
 0x157   :  { %v538_v7 = vadd.f32 %v520_v51, %v463_v5 }
 0x158   :  { %v595_v44 = vpop.f32.mrf.mxu2 }
 0x159   :  { %v535_v3 = vpop.f32.mrf.mxu0  ;;  %v584_v4 = vpop.f32.mrf.mxu1  ;;  %v613_v14 = vadd.f32 %v595_v44, %v538_v7 }
 0x15e   :  { %v522_v12 = vpop.f32.mrf.mxu3 }
 0x160   :  { %v597_v15 = vpop.f32.mrf.mxu2 }
 0x161   :  { %v657_v18 = vpop.f32.mrf.mxu0  ;;  %v670_v58 = vpop.f32.mrf.mxu1 }
 0x162   :  { %v687_v19 = vadd.f32 %v657_v18, %v612_v13  ;;  %v688_v22 = vadd.f32 %v670_v58, %v613_v14 }
 0x164   :  { %v690_v24 = vmax.f32 %v687_v19, 0.0  ;;  %v691_v25 = vmax.f32 %v688_v22, 0.0 }
 0x166   :  { %693 = vst [vmem:[#allocation2] sm:$0xff] %v690_v24  ;;  %v608_v43 = vpop.f32.mrf.mxu3 }
 0x167   :  { %694 = vst [vmem:[#allocation2 + $0x8] sm:$0xff] %v691_v25  ;;  %v614_v10 = vadd.f32 %v608_v43, %v539_v27 }
 0x168   :  { %v683_v62 = vpop.f32.mrf.mxu2 }
 0x169   :  { %v659_v28 = vpop.f32.mrf.mxu0  ;;  %v672_v29 = vpop.f32.mrf.mxu1  ;;  %v689_v30 = vadd.f32 %v683_v62, %v614_v10 }
 0x16b   :  { %v692_v31 = vmax.f32 %v689_v30, 0.0 }
 0x16d   :  { %695 = vst [vmem:[#allocation2 + $0x10] sm:$0xff] %v692_v31 }
 0x16e   :  { %v610_v33 = vpop.f32.mrf.mxu3 }
 0x170   :  { %v685_v34 = vpop.f32.mrf.mxu2 }
 0x171   :  { %v731_v35 = vpop.f32.mrf.mxu0  ;;  %v744_v36 = vpop.f32.mrf.mxu1 }
 0x172   :  { %v750_v32 = vadd.f32 %v744_v36, %v1830_v26  ;;  %v749_v14 = vadd.f32 %v731_v35, %v1830_v26 }
 0x176   :  { %v718_v40 = vpop.f32.mrf.mxu3 }
 0x177   :  { %v748_v42 = vadd.f32 %v718_v40, %v1830_v26 }
 0x178   :  { %v789_v8 = vpop.f32.mrf.mxu2 }
 0x179   :  { %v733_v45 = vpop.f32.mrf.mxu0  ;;  %v746_v46 = vpop.f32.mrf.mxu1  ;;  %v819_v16 = vadd.f32 %v789_v8, %v748_v42 }
 0x17e   :  { %v720_v37 = vpop.f32.mrf.mxu3 }
 0x180   :  { %v791_v38 = vpop.f32.mrf.mxu2 }
 0x181   :  { %v815_v48 = vpop.f32.mrf.mxu0  ;;  %v860_v49 = vpop.f32.mrf.mxu1 }
 0x182   :  { %v821_v20 = vadd.f32 %v815_v48, %v750_v32  ;;  %v890_v50 = vadd.f32 %v860_v49, %v819_v16 }
 0x186   :  { %v802_v52 = vpop.f32.mrf.mxu3 }
 0x187   :  { %v820_v17 = vadd.f32 %v802_v52, %v749_v14 }
 0x188   :  { %v873_v53 = vpop.f32.mrf.mxu2 }
 0x189   :  { %v817_v56 = vpop.f32.mrf.mxu0  ;;  %v862_v39 = vpop.f32.mrf.mxu1  ;;  %v891_v23 = vadd.f32 %v873_v53, %v820_v17 }
 0x18e   :  { %v804_v21 = vpop.f32.mrf.mxu3 }
 0x190   :  { %v875_v57 = vpop.f32.mrf.mxu2 }
 0x191   :  { %v931_v0 = vpop.f32.mrf.mxu0  ;;  %v944_v60 = vpop.f32.mrf.mxu1 }
 0x192   :  { %v962_v24 = vadd.f32 %v944_v60, %v891_v23  ;;  %v961_v33 = vadd.f32 %v931_v0, %v890_v50 }
 0x196   :  { %v886_v61 = vpop.f32.mrf.mxu3 }
 0x197   :  { %v892_v22 = vadd.f32 %v886_v61, %v821_v20 }
 0x198   :  { %v957_v63 = vpop.f32.mrf.mxu2 }
 0x199   :  { %v933_v41 = vpop.f32.mrf.mxu0  ;;  %v946_v1 = vpop.f32.mrf.mxu1  ;;  %v963_v25 = vadd.f32 %v957_v63, %v892_v22 }
 0x19e   :  { %v888_v54 = vpop.f32.mrf.mxu3 }
 0x1a0   :  { %v959_v55 = vpop.f32.mrf.mxu2 }
 0x1a1   :  { %v1015_v51 = vpop.f32.mrf.mxu0  ;;  %v1028_v59 = vpop.f32.mrf.mxu1 }
 0x1a2   :  { %v1033_v43 = vadd.f32 %v1015_v51, %v962_v24  ;;  %v1034_v10 = vadd.f32 %v1028_v59, %v963_v25 }
 0x1a6   :  { %v1002_v2 = vpop.f32.mrf.mxu3 }
 0x1a7   :  { %v1032_v26 = vadd.f32 %v1002_v2, %v961_v33 }
 0x1a8   :  { %v1073_v44 = vpop.f32.mrf.mxu2 }
 0x1a9   :  { %v1017_v3 = vpop.f32.mrf.mxu0  ;;  %v1030_v4 = vpop.f32.mrf.mxu1  ;;  %v1103_v45 = vadd.f32 %v1073_v44, %v1032_v26 }
 0x1ae   :  { %v1004_v5 = vpop.f32.mrf.mxu3 }
 0x1b0   :  { %v1075_v6 = vpop.f32.mrf.mxu2 }
 0x1b1   :  { %v1099_v47 = vpop.f32.mrf.mxu0  ;;  %v1144_v7 = vpop.f32.mrf.mxu1 }
 0x1b2   :  { %v1105_v30 = vadd.f32 %v1099_v47, %v1034_v10  ;;  %v1174_v38 = vadd.f32 %v1144_v7, %v1103_v45 }
 0x1b6   :  { %v1086_v9 = vpop.f32.mrf.mxu3 }
 0x1b7   :  { %v1104_v31 = vadd.f32 %v1086_v9, %v1033_v43 }
 0x1b8   :  { %v1157_v11 = vpop.f32.mrf.mxu2 }
 0x1b9   :  { %v1101_v12 = vpop.f32.mrf.mxu0  ;;  %v1146_v13 = vpop.f32.mrf.mxu1  ;;  %v1175_v35 = vadd.f32 %v1157_v11, %v1104_v31 }
 0x1be   :  { %v1088_v15 = vpop.f32.mrf.mxu3 }
 0x1c0   :  { %v1159_v18 = vpop.f32.mrf.mxu2 }
 0x1c1   :  { %v1215_v58 = vpop.f32.mrf.mxu0  ;;  %v1228_v19 = vpop.f32.mrf.mxu1 }
 0x1c2   :  { %v1246_v40 = vadd.f32 %v1228_v19, %v1175_v35  ;;  %v1245_v20 = vadd.f32 %v1215_v58, %v1174_v38 }
 0x1c6   :  { %v1170_v27 = vpop.f32.mrf.mxu3 }
 0x1c7   :  { %v1176_v34 = vadd.f32 %v1170_v27, %v1105_v30 }
 0x1c8   :  { %v1241_v62 = vpop.f32.mrf.mxu2 }
 0x1c9   :  { %v1217_v28 = vpop.f32.mrf.mxu0  ;;  %v1230_v29 = vpop.f32.mrf.mxu1  ;;  %v1247_v42 = vadd.f32 %v1241_v62, %v1176_v34 }
 0x1ce   :  { %v1172_v36 = vpop.f32.mrf.mxu3 }
 0x1d0   :  { %v1243_v8 = vpop.f32.mrf.mxu2 }
 0x1d1   :  { %v1299_v46 = vpop.f32.mrf.mxu0  ;;  %v1312_v16 = vpop.f32.mrf.mxu1 }
 0x1d2   :  { %v1317_v37 = vadd.f32 %v1299_v46, %v1246_v40  ;;  %v1318_v32 = vadd.f32 %v1312_v16, %v1247_v42 }
 0x1d4   :  { %v1320_v48 = vmax.f32 %v1317_v37, 0.0  ;;  %v1321_v49 = vmax.f32 %v1318_v32, 0.0 }
 0x1d6   :  { %1324 = vst [vmem:[#allocation2 + $0x20] sm:$0xff] %v1320_v48  ;;  %v1286_v50 = vpop.f32.mrf.mxu3 }
 0x1d7   :  { %1325 = vst [vmem:[#allocation2 + $0x28] sm:$0xff] %v1321_v49  ;;  %v1316_v52 = vadd.f32 %v1286_v50, %v1245_v20 }
 0x1d9   :  { %v1319_v53 = vmax.f32 %v1316_v52, 0.0  ;;  %v1301_v56 = vpop.f32.mrf.mxu0  ;;  %v1314_v39 = vpop.f32.mrf.mxu1 }
 0x1db   :  { %1323 = vst [vmem:[#allocation2 + $0x18] sm:$0xff] %v1319_v53 }
 0x1dc   :  { %1338 = dma.vmem_to_hbm [thread:$0]  %s1331_s15, 768, %s1333_s18, [#allocation3], %s1449_s19, %s1449_s19, %s1450_s20  }
 0x1de   :  { %v1288_v21 = vpop.f32.mrf.mxu3 }
 0x1df   :  { %1437 = dma.done.wait [#allocation3], 768  }
 0x1e0   :  { %1438 = vsyncadd [#allocation3], 4294966528 }
 0x1e1   :  { %1343 = vsyncpa [#allocation3], 1 }

</bundles_post_ra>
